<compile_context>
chip_gen: v7x
topology: tpu7x:2x2x1
jax: 0.10.0
libtpu: 0.0.40
codegen_flags: <defaults>
</compile_context>

<pallas_src>
import functools

import jax
import jax.numpy as jnp
from jax import lax
from jax.experimental import pallas as pl
from jax.experimental.pallas import tpu as pltpu


def _round_up(x, m):
    return ((x + m - 1) // m) * m


def _vmem_limit_bytes():
    # v5e/v6e: 128 MiB physical VMEM, v7x: 64 MiB.  Use roughly half as the
    # scoped limit so double-buffered blocks keep headroom on every chip.
    cap = 64 * 1024 * 1024
    try:
        info = pltpu.get_tpu_info()
        cap = int(getattr(info, "vmem_capacity_bytes", cap))
    except Exception:
        pass
    return int(min(max(cap // 2, 32 * 1024 * 1024), 96 * 1024 * 1024))


def _pick_b_tile(batch, row_bytes, budget_bytes):
    """Rows per block for kernel 1, bounded by the bert-block VMEM budget."""
    cap = max(1, budget_bytes // max(1, row_bytes))
    if batch <= 8:
        return batch
    # Prefer 8-aligned divisors of batch that fit the budget and leave >= 2
    # grid blocks (v7x megacore).
    for cand in (256, 128, 64, 32, 16, 8):
        if batch % cand == 0 and cand <= cap and 2 * cand <= batch:
            return cand
    for cand in range(min(cap, batch), 0, -1):
        if batch % cand == 0:
            return cand
    return 1


def _pick_e_chunk(e_dim):
    if e_dim <= 512:
        return e_dim
    for cand in (512, 384, 256, 128):
        if e_dim % cand == 0:
            return cand
    return e_dim


def _pick_tile_v(vocab, bt):
    # Keep the per-T-step working set (accumulator + compare/select temps)
    # roughly inside the 64 x 4KiB vreg file: bt * tile_v <= 16K f32 elements.
    vreg_cap = max(128, (16384 // max(1, bt)) // 128 * 128)
    tile_v = min(2048, vreg_cap)
    return min(tile_v, _round_up(vocab, 128))


# --------------------------------------------------------------------------
# Kernel 1: attention weights, coverage update, per-row coverage loss.
# --------------------------------------------------------------------------
def _attn_cov_kernel(hidden_ref, bert_ref, cov_ref, ws_ref, wb_ref, bias_ref,
                     attn_ref, cov_out_ref, loss_ref, *, e_chunk):
    # hidden_ref : [Bt, H]     f32
    # bert_ref   : [Bt, T, E]  native dtype (reduced chunk-wise in f32)
    # cov_ref    : [Bt, T]     f32
    # ws_ref     : [1, H]      f32   (Linear_s weight)
    # wb_ref     : [1, E]      f32   (Linear_b weight)
    # bias_ref   : [1, 1]      f32   (Linear_s bias + Linear_b bias)
    bt, t, e_dim = bert_ref.shape
    n_chunks = e_dim // e_chunk

    hidden = hidden_ref[...]
    cov = cov_ref[...]
    ws = ws_ref[...]
    bias = bias_ref[...]                                   # [1, 1], broadcasts

    # Degenerate (out_features = 1) projections: VPU multiply + lane reduce.
    s_proj = jnp.sum(hidden * ws, axis=-1, keepdims=True)  # [Bt, 1]

    if n_chunks == 1:
        bert = bert_ref[...].astype(jnp.float32)
        b_proj = jnp.sum(bert * wb_ref[...][None, :, :], axis=-1)      # [Bt, T]
    else:
        # Chunked E reduction: only one e_chunk-wide f32 slice is live at a
        # time, so the native-dtype block stays the only large VMEM resident.
        def chunk_body(c, acc):
            off = pl.multiple_of(c * e_chunk, e_chunk)
            b_c = bert_ref[:, :, pl.ds(off, e_chunk)].astype(jnp.float32)
            w_c = wb_ref[:, pl.ds(off, e_chunk)]
            return acc + jnp.sum(b_c * w_c[None, :, :], axis=-1)

        b_proj = lax.fori_loop(0, n_chunks, chunk_body,
                               jnp.zeros((bt, t), jnp.float32),
                               unroll=min(n_chunks, 4))

    # tanh output is bounded in [-1, 1]; the softmax max-subtraction is
    # unnecessary.
    z = jnp.tanh(s_proj + b_proj + cov + bias)                          # [Bt, T]
    e_z = jnp.exp(z)
    attn = e_z / jnp.sum(e_z, axis=-1, keepdims=True)                   # softmax T

    cov_new = cov + attn
    attn_ref[...] = attn
    cov_out_ref[...] = cov_new
    # Per-row partial of CoverageLoss = sum_t min(attn, updated coverage),
    # matching torch.min(cat((attn, cov_new), 2), dim=2) -> sum.
    loss_ref[...] = jnp.sum(jnp.minimum(attn, cov_new), axis=-1, keepdims=True)


# --------------------------------------------------------------------------
# Kernel 2: scatter attention weights onto a lane-dense vocabulary slab.
# --------------------------------------------------------------------------
def _scatter_kernel(attn_ref, src_ref, prob_ref, *, unroll):
    # attn_ref : [Bt, T]       f32
    # src_ref  : [Bt, T]       int32 (global vocab ids)
    # prob_ref : [Bt, TILE_V]  f32 out (one lane-dense vocab slab)
    j = pl.program_id(1)
    bt, t = attn_ref.shape
    tile_v = prob_ref.shape[1]

    # Global vocab ids covered by this slab; hoisted (loop-invariant).
    lane_ids = lax.broadcasted_iota(jnp.int32, (1, tile_v), 1) + j * tile_v

    def body(ti, acc):
        ids = src_ref[:, pl.ds(ti, 1)]            # [Bt, 1]
        w = attn_ref[:, pl.ds(ti, 1)]             # [Bt, 1]
        return acc + jnp.where(ids == lane_ids, w, jnp.float32(0.0))

    acc = lax.fori_loop(0, t, body,
                        jnp.zeros((bt, tile_v), jnp.float32),
                        unroll=unroll)
    prob_ref[...] = acc                            # single lane-dense store


# --------------------------------------------------------------------------
# Wrapper
# --------------------------------------------------------------------------
def copy_attention_distribution(current_hidden_state, bert_inputs, source,
                                output_size, coverage, ws, bs, wb, bb):
    B, _, H = current_hidden_state.shape
    _, T, E = bert_inputs.shape
    assert H == E, "hidden_size must equal embedding_size"

    hidden = current_hidden_state.reshape(B, H).astype(jnp.float32)
    cov = coverage.reshape(B, T).astype(jnp.float32)
    src = source.astype(jnp.int32)
    ws_f = ws.reshape(1, H).astype(jnp.float32)
    wb_f = wb.reshape(1, E).astype(jnp.float32)
    bias = (bs.reshape(-1)[:1] + bb.reshape(-1)[:1]).astype(jnp.float32).reshape(1, 1)

    vmem_limit = _vmem_limit_bytes()

    # ---- Kernel 1: attention weights, coverage update, per-row loss --------
    bert_bytes = jnp.dtype(bert_inputs.dtype).itemsize
    row_bytes = T * E * bert_bytes + (3 * T + H + 1) * 4
    b_tile = _pick_b_tile(B, row_bytes, vmem_limit // 4)
    e_chunk = _pick_e_chunk(E)

    kernel1 = functools.partial(_attn_cov_kernel, e_chunk=e_chunk)
    attn, cov_new, loss_rows = pl.pallas_call(
        kernel1,
        out_shape=(
            jax.ShapeDtypeStruct((B, T), jnp.float32),
            jax.ShapeDtypeStruct((B, T), jnp.float32),
            jax.ShapeDtypeStruct((B, 1), jnp.float32),
        ),
        grid=(pl.cdiv(B, b_tile),),
        in_specs=[
            pl.BlockSpec((b_tile, H), lambda i: (i, 0)),
            pl.BlockSpec((b_tile, T, E), lambda i: (i, 0, 0)),   # native dtype DMA
            pl.BlockSpec((b_tile, T), lambda i: (i, 0)),
            pl.BlockSpec((1, H), lambda i: (0, 0)),
            pl.BlockSpec((1, E), lambda i: (0, 0)),
            pl.BlockSpec((1, 1), lambda i: (0, 0)),
        ],
        out_specs=(
            pl.BlockSpec((b_tile, T), lambda i: (i, 0)),
            pl.BlockSpec((b_tile, T), lambda i: (i, 0)),
            pl.BlockSpec((b_tile, 1), lambda i: (i, 0)),
        ),
        compiler_params=pltpu.CompilerParams(
            dimension_semantics=("parallel",),
            vmem_limit_bytes=vmem_limit),
    )(hidden, bert_inputs, cov, ws_f, wb_f, bias)

    # ---- Kernel 2: scatter attention weights onto the vocabulary -----------
    bt2 = min(b_tile, 8) if B >= 8 else b_tile
    tile_v = _pick_tile_v(output_size, bt2)
    kernel2 = functools.partial(_scatter_kernel, unroll=min(T, 8))
    prob = pl.pallas_call(
        kernel2,
        out_shape=jax.ShapeDtypeStruct((B, output_size), jnp.float32),
        grid=(pl.cdiv(B, bt2), pl.cdiv(output_size, tile_v)),
        in_specs=[
            pl.BlockSpec((bt2, T), lambda i, j: (i, 0)),
            pl.BlockSpec((bt2, T), lambda i, j: (i, 0)),
        ],
        out_specs=pl.BlockSpec((bt2, tile_v), lambda i, j: (i, j)),
        compiler_params=pltpu.CompilerParams(
            dimension_semantics=("parallel", "parallel"),
            vmem_limit_bytes=vmem_limit),
    )(attn, src)

    loss = jnp.sum(loss_rows)
    return prob, cov_new.reshape(B, T, 1), loss


# --------------------------------------------------------------------------
# Pure-JAX reference (mirrors the PyTorch forward) and tests.
# --------------------------------------------------------------------------
def _reference(current_hidden_state, bert_inputs, source, output_size,
               coverage, ws, bs, wb, bb):
    B, _, H = current_hidden_state.shape
    hidden = current_hidden_state.reshape(B, H)
    bert = bert_inputs.astype(jnp.float32)
    s_proj = hidden @ ws.T + bs                               # [B, 1]
    b_proj = bert @ wb.T + bb[None, None, :]                  # [B, T, 1]
    z = jnp.tanh(s_proj[:, None, :] + b_proj + coverage)      # [B, T, 1]
    attn = jax.nn.softmax(z, axis=1)
    cov_new = coverage + attn
    loss = jnp.sum(jnp.minimum(attn, cov_new)).astype(jnp.float32)
    onehot = jax.nn.one_hot(source, output_size, dtype=jnp.float32)  # [B, T, V]
    prob = jnp.einsum('bt,btv->bv', attn[..., 0], onehot)
    return prob, cov_new, loss


def _run_case(key, B, T, H, V):
    k_h, k_b, k_src, k_cov, k_ws, k_bs, k_wb, k_bb = jax.random.split(key, 8)
    current_hidden_state = jax.random.normal(k_h, (B, 1, H), jnp.float32)
    bert_inputs = jax.random.normal(k_b, (B, T, H), jnp.float32)
    source = jax.random.randint(k_src, (B, T), 0, V, dtype=jnp.int32)
    coverage = jax.random.uniform(k_cov, (B, T, 1), jnp.float32, 0.0, 0.1)
    ws = jax.random.normal(k_ws, (1, H), jnp.float32) * 0.1
    bs = jax.random.normal(k_bs, (1,), jnp.float32) * 0.1
    wb = jax.random.normal(k_wb, (1, H), jnp.float32) * 0.1
    bb = jax.random.normal(k_bb, (1,), jnp.float32) * 0.1

    prob, cov_new, loss = copy_attention_distribution(
        current_hidden_state, bert_inputs, source, V, coverage, ws, bs, wb, bb)
    jax.block_until_ready((prob, cov_new, loss))

    prob_r, cov_r, loss_r = _reference(
        current_hidden_state, bert_inputs, source, V, coverage, ws, bs, wb, bb)
    assert prob.shape == (B, V)
    assert cov_new.shape == (B, T, 1)
    assert jnp.allclose(prob, prob_r, atol=1e-5), "copy prob mismatch"
    assert jnp.allclose(cov_new, cov_r, atol=1e-5), "coverage mismatch"
    assert jnp.allclose(loss, loss_r, atol=1e-5), "coverage loss mismatch"


if __name__ == "__main__":
    key = jax.random.PRNGKey(0)
    k1, k2, k3 = jax.random.split(key, 3)
    # Small case: single block everywhere, vocab smaller than one 128-lane slab.
    _run_case(k1, B=2, T=8, H=32, V=16)
    # Exercises the B grid (b_tile=8, 2 blocks) and a non-multiple-of-128 vocab.
    _run_case(k2, B=16, T=8, H=32, V=200)
    # Exercises the chunked-E reduction (E=1024 -> 2 chunks) and the T loop.
    _run_case(k3, B=16, T=16, H=1024, V=1000)
    print("KERNEL_OK")
</pallas_src>

<mosaic_0001>
module attributes {stable_mosaic.version = 11 : i64} {
  func.func @_attn_cov_kernel(%arg0: i32, %arg1: memref<2x32xf32, #tpu.memory_space<vmem>>, %arg2: memref<2x8x32xf32, #tpu.memory_space<vmem>>, %arg3: memref<2x8xf32, #tpu.memory_space<vmem>>, %arg4: memref<1x32xf32, #tpu.memory_space<vmem>>, %arg5: memref<1x32xf32, #tpu.memory_space<vmem>>, %arg6: memref<1x1xf32, #tpu.memory_space<vmem>>, %arg7: memref<2x8xf32, #tpu.memory_space<vmem>>, %arg8: memref<2x8xf32, #tpu.memory_space<vmem>>, %arg9: memref<2x1xf32, #tpu.memory_space<vmem>>) attributes {dimension_semantics = [#tpu.dimension_semantics<parallel>], iteration_bounds = array<i64: 1>, scalar_prefetch = 0 : i64, scratch_operands = 0 : i64, tpu.core_type = #tpu.core_type<tc>, window_params = [{transform_indices = @transform_0, window_bounds = array<i64: 2, 32>}, {transform_indices = @transform_1, window_bounds = array<i64: 2, 8, 32>}, {transform_indices = @transform_2, window_bounds = array<i64: 2, 8>}, {pipeline_mode = #tpu.pipeline_mode<synchronous>, transform_indices = @transform_3, window_bounds = array<i64: 1, 32>}, {pipeline_mode = #tpu.pipeline_mode<synchronous>, transform_indices = @transform_4, window_bounds = array<i64: 1, 32>}, {pipeline_mode = #tpu.pipeline_mode<synchronous>, transform_indices = @transform_5, window_bounds = array<i64: 1, 1>}, {transform_indices = @transform_6, window_bounds = array<i64: 2, 8>}, {transform_indices = @transform_7, window_bounds = array<i64: 2, 8>}, {transform_indices = @transform_8, window_bounds = array<i64: 2, 1>}]} {
    %c0 = arith.constant 0 : index
    %c0_0 = arith.constant 0 : index
    %0 = vector.load %arg1[%c0, %c0_0] : memref<2x32xf32, #tpu.memory_space<vmem>>, vector<2x32xf32>
    %c0_1 = arith.constant 0 : index
    %c0_2 = arith.constant 0 : index
    %1 = vector.load %arg3[%c0_1, %c0_2] : memref<2x8xf32, #tpu.memory_space<vmem>>, vector<2x8xf32>
    %c0_3 = arith.constant 0 : index
    %c0_4 = arith.constant 0 : index
    %2 = vector.load %arg4[%c0_3, %c0_4] : memref<1x32xf32, #tpu.memory_space<vmem>>, vector<1x32xf32>
    %c0_5 = arith.constant 0 : index
    %c0_6 = arith.constant 0 : index
    %3 = vector.load %arg6[%c0_5, %c0_6] : memref<1x1xf32, #tpu.memory_space<vmem>>, vector<1x1xf32>
    %4 = vector.broadcast %2 : vector<1x32xf32> to vector<2x32xf32>
    %5 = arith.mulf %0, %4 : vector<2x32xf32>
    %cst = arith.constant dense<0.000000e+00> : vector<2xf32>
    %6 = vector.multi_reduction <add>, %5, %cst [1] : vector<2x32xf32> to vector<2xf32>
    %7 = vector.shape_cast %6 : vector<2xf32> to vector<2x1xf32>
    %c0_7 = arith.constant 0 : index
    %c0_8 = arith.constant 0 : index
    %c0_9 = arith.constant 0 : index
    %8 = vector.load %arg2[%c0_7, %c0_8, %c0_9] : memref<2x8x32xf32, #tpu.memory_space<vmem>>, vector<2x8x32xf32>
    %c0_10 = arith.constant 0 : index
    %c0_11 = arith.constant 0 : index
    %9 = vector.load %arg5[%c0_10, %c0_11] : memref<1x32xf32, #tpu.memory_space<vmem>>, vector<1x32xf32>
    %10 = vector.shape_cast %9 : vector<1x32xf32> to vector<1x1x32xf32>
    %11 = vector.broadcast %10 : vector<1x1x32xf32> to vector<2x8x32xf32>
    %12 = arith.mulf %8, %11 : vector<2x8x32xf32>
    %cst_12 = arith.constant dense<0.000000e+00> : vector<2x8xf32>
    %13 = vector.multi_reduction <add>, %12, %cst_12 [2] : vector<2x8x32xf32> to vector<2x8xf32>
    %14 = vector.broadcast %7 : vector<2x1xf32> to vector<2x8xf32>
    %15 = arith.addf %14, %13 : vector<2x8xf32>
    %16 = arith.addf %15, %1 : vector<2x8xf32>
    %17 = vector.broadcast %3 : vector<1x1xf32> to vector<2x8xf32>
    %18 = arith.addf %16, %17 : vector<2x8xf32>
    %19 = math.tanh %18 : vector<2x8xf32>
    %20 = math.exp %19 : vector<2x8xf32>
    %cst_13 = arith.constant dense<0.000000e+00> : vector<2xf32>
    %21 = vector.multi_reduction <add>, %20, %cst_13 [1] : vector<2x8xf32> to vector<2xf32>
    %22 = vector.shape_cast %21 : vector<2xf32> to vector<2x1xf32>
    %23 = vector.broadcast %22 : vector<2x1xf32> to vector<2x8xf32>
    %24 = arith.divf %20, %23 : vector<2x8xf32>
    %25 = arith.addf %1, %24 : vector<2x8xf32>
    %c0_14 = arith.constant 0 : index
    %c0_15 = arith.constant 0 : index
    %26 = vector.load %arg7[%c0_14, %c0_15] : memref<2x8xf32, #tpu.memory_space<vmem>>, vector<2x8xf32>
    tpu.vector_store %arg7[%c0_14, %c0_15], %24 {strides = array<i32>} : memref<2x8xf32, #tpu.memory_space<vmem>>, vector<2x8xf32>,
    %c0_16 = arith.constant 0 : index
    %c0_17 = arith.constant 0 : index
    %27 = vector.load %arg8[%c0_16, %c0_17] : memref<2x8xf32, #tpu.memory_space<vmem>>, vector<2x8xf32>
    tpu.vector_store %arg8[%c0_16, %c0_17], %25 {strides = array<i32>} : memref<2x8xf32, #tpu.memory_space<vmem>>, vector<2x8xf32>,
    %28 = arith.minimumf %24, %25 : vector<2x8xf32>
    %cst_18 = arith.constant dense<0.000000e+00> : vector<2xf32>
    %29 = vector.multi_reduction <add>, %28, %cst_18 [1] : vector<2x8xf32> to vector<2xf32>
    %30 = vector.shape_cast %29 : vector<2xf32> to vector<2x1xf32>
    %c0_19 = arith.constant 0 : index
    %c0_20 = arith.constant 0 : index
    %31 = vector.load %arg9[%c0_19, %c0_20] : memref<2x1xf32, #tpu.memory_space<vmem>>, vector<2x1xf32>
    tpu.vector_store %arg9[%c0_19, %c0_20], %30 {strides = array<i32>} : memref<2x1xf32, #tpu.memory_space<vmem>>, vector<2x1xf32>,
    return
  }
  func.func @transform_0(%arg0: i32) -> (i32, i32) {
    %c0_i32 = arith.constant 0 : i32
    %c0_i32_0 = arith.constant 0 : i32
    return %arg0, %c0_i32 : i32, i32
  }
  func.func @transform_1(%arg0: i32) -> (i32, i32, i32) {
    %c0_i32 = arith.constant 0 : i32
    %c0_i32_0 = arith.constant 0 : i32
    %c0_i32_1 = arith.constant 0 : i32
    return %arg0, %c0_i32, %c0_i32_0 : i32, i32, i32
  }
  func.func @transform_2(%arg0: i32) -> (i32, i32) {
    %c0_i32 = arith.constant 0 : i32
    %c0_i32_0 = arith.constant 0 : i32
    return %arg0, %c0_i32 : i32, i32
  }
  func.func @transform_3(%arg0: i32) -> (i32, i32) {
    %c0_i32 = arith.constant 0 : i32
    %c0_i32_0 = arith.constant 0 : i32
    %c0_i32_1 = arith.constant 0 : i32
    return %c0_i32, %c0_i32_0 : i32, i32
  }
  func.func @transform_4(%arg0: i32) -> (i32, i32) {
    %c0_i32 = arith.constant 0 : i32
    %c0_i32_0 = arith.constant 0 : i32
    %c0_i32_1 = arith.constant 0 : i32
    return %c0_i32, %c0_i32_0 : i32, i32
  }
  func.func @transform_5(%arg0: i32) -> (i32, i32) {
    %c0_i32 = arith.constant 0 : i32
    %c0_i32_0 = arith.constant 0 : i32
    %c0_i32_1 = arith.constant 0 : i32
    return %c0_i32, %c0_i32_0 : i32, i32
  }
  func.func @transform_6(%arg0: i32) -> (i32, i32) {
    %c0_i32 = arith.constant 0 : i32
    %c0_i32_0 = arith.constant 0 : i32
    return %arg0, %c0_i32 : i32, i32
  }
  func.func @transform_7(%arg0: i32) -> (i32, i32) {
    %c0_i32 = arith.constant 0 : i32
    %c0_i32_0 = arith.constant 0 : i32
    return %arg0, %c0_i32 : i32, i32
  }
  func.func @transform_8(%arg0: i32) -> (i32, i32) {
    %c0_i32 = arith.constant 0 : i32
    %c0_i32_0 = arith.constant 0 : i32
    return %arg0, %c0_i32 : i32, i32
  }
}

</mosaic_0001>

<bundles_post_ra>
// kernel: tpu_custom_call.1
= control target key start
LH: loop header
LB: loop body
LE: loop exit
PB: predicated region body
PF: predicated region fallthrough
CT: control target
= control target key end

     0   :  { %s349_s0 = inlined_call_operand.vmem [shape: f32[2,32], index: 0, kind: input, shape index: {}]   ;;  %s350_s1 = inlined_call_operand.hbm [shape: f32[2,8,32], index: 1, kind: input, shape index: {}]   ;;  %s351_s2 = inlined_call_operand.vmem [shape: f32[2,8], index: 2, kind: input, shape index: {}]   ;;  %s352_s3 = inlined_call_operand.vmem [shape: f32[1,32], index: 3, kind: input, shape index: {}]   ;;  %s353_s4 = inlined_call_operand.vmem [shape: f32[1,32], index: 4, kind: input, shape index: {}]   ;;  %s354_s5 = inlined_call_operand.<no memory space> [shape: f32[1,1], index: 5, kind: input, shape index: {}]   ;;  %s355_s6 = inlined_call_operand.hbm [shape: f32[2,8], index: 6, kind: output, shape index: {0}]   ;;  %s356_s7 = inlined_call_operand.hbm [shape: f32[2,8], index: 7, kind: output, shape index: {1}]   ;;  %s357_s8 = inlined_call_operand.vmem [shape: f32[2,1], index: 8, kind: output, shape index: {2}]  }
   0x1   :  { %v14_v0 = vstv %s354_s5 }
   0x2   :  { %15 = vst [vmem:[#allocation2] sm:$0x1] %v14_v0 }
   0x3   :  { %16 = vsyncpa [#allocation4], 0 }
   0x4   :  { %17 = vsyncpa [#allocation5], 0 }
   0x5   :  { %18 = vsyncpa [#allocation8], 0  ;;  %s244_s29 = smov [#allocation3]   ;;  %s172_s11 = scalar_lea.hbm %s350_s1, 256 }
   0x6   :  { %s26_s30 = sshll.u32 %s244_s29, 4  ;;  %p173_p0 = scmp.ne.s32.totalorder %s350_s1, %s172_s11  ;;  %s27_s30 = int_to_ptr.vmem [resolvable:$true] %s26_s30 }
   0x7   :  { %p176_p1 = scmp.lt.u32.totalorder %s172_s11, %s350_s1 }
   0x9   :  { %p178_p2 = pnand %p176_p1, %p173_p0 }
   0xb   :  { %181 = shalt.err (!%p178_p2)
}
   0xc   :  { %s182_s5 = scalar_lea.vmem %s27_s30, 256  ;;  %p187_p4 = scmp.lt.s32.totalorder %s27_s30, %s27_s30 }
   0xd   :  { %p183_p3 = scmp.ne.s32.totalorder %s27_s30, %s182_s5  ;;  %p188_p5 = scmp.lt.s32.totalorder %s182_s5, %s182_s5 }
   0xf   :  { %p189_p6 = por %p188_p5, %p187_p4 }
  0x11   :  { %p190_p7 = pnand %p189_p6, %p183_p3 }
  0x13   :  { %193 = shalt.err (!%p190_p7)
}
  0x14   :  { %s245_s16 = smov 128   ;;  %s246_s17 = smov 8  }
  0x15   :  { %32 = dma.hbm_to_vmem [thread:$0]  %s350_s1, 256, %s27_s30, [#allocation4], %s245_s16, %s245_s16, %s246_s17  }
  0x16   :  { %238 = dma.done.wait [#allocation4], 256  }
  0x17   :  { %239 = vsyncadd [#allocation4], 4294967040  ;;  %v247_v1 = vmov 0   ;;  %v59_v2 = vld [vmem:[#allocation3] sm:$0xff]  ;;  %v156_v3 = vld [vmem:[%s353_s4] ss:$0 sm:$0xff]  ;;  %v79_v14 = vlaneseq }
  0x18   :  { %164 = vset.pattern.permute.xlu1 %v247_v1  ;;  %165 = vset.pattern.permute.xlu0 %v247_v1  ;;  %vm70_vm0 = vcmask 261120   ;;  %v60_v4 = vld [vmem:[#allocation3 + $0x8] sm:$0xff]  ;;  %v68_v5 = vmul.f32 %v156_v3, %v59_v2  ;;  %v44_v7 = vld [vmem:[%s349_s0] sm:$0x3]  ;;  %vm55_vm1 = vcmask 254976   ;;  %vm89_vm2 = vcmask 1041409  }
  0x19   :  { %v69_v6 = vmul.f32 %v156_v3, %v60_v4  ;;  %v155_v8 = vld [vmem:[%s352_s3] ss:$0 sm:$0xff]  ;;  %v80_v15 = vand.u32 127, %v79_v14  ;;  %v82_v16 = vshrl.u32 %v79_v14, 7  ;;  %vm107_vm3 = vcmask 58368   ;;  %s249_s25 = smov [#allocation7]  }
  0x1a   :  { %v54_v9 = vmul.f32 %v155_v8, %v44_v7  ;;  %v71_v10 = vsel %vm70_vm0, %v68_v5, 0.0  ;;  %v157_v13 = vld [vmem:[#allocation2] ss:$0 sm:$0xff]  ;;  %s138_s26 = sshll.u32 %s249_s25, 4  ;;  %s139_s26 = int_to_ptr.vmem [resolvable:$true] %s138_s26 }
  0x1b   :  { %72 = vadd.xlane.f32.xlu0 %v71_v10  ;;  %v74_v12 = vsel %vm70_vm0, %v69_v6, 0.0  ;;  %v83_v18 = vsub.s32 %v80_v15, %v82_v16  ;;  %v45_v24 = vld [vmem:[%s351_s2] sm:$0x3]  ;;  %s248_s2 = smov [#allocation6]  }
  0x1c   :  { %v56_v11 = vsel %vm55_vm1, %v54_v9, 0.0  ;;  %s128_s4 = sshll.u32 %s248_s2, 4  ;;  %s129_s4 = int_to_ptr.vmem [resolvable:$true] %s128_s4 }
  0x1d   :  { %57 = vadd.xlane.f32.xlu1 %v56_v11  ;;  %s194_s27 = scalar_lea.vmem %s129_s4, 32  ;;  %p199_p9 = scmp.lt.s32.totalorder %s129_s4, %s129_s4 }
  0x1e   :  { %p195_p8 = scmp.ne.s32.totalorder %s129_s4, %s194_s27  ;;  %p200_p10 = scmp.lt.s32.totalorder %s194_s27, %s194_s27 }
  0x1f   :  { %75 = vadd.xlane.f32.xlu0 %v74_v12 }
  0x20   :  { %p201_p11 = por %p200_p10, %p199_p9 }
  0x22   :  { %p202_p12 = pnand %p201_p11, %p195_p8 }
  0x2e   :  { %100 = vperm.xlu1 %164, %v157_v13  }
  0xa8   :  { %v73_v17 = vpop.xlane.xlu0 %72 }
  0xa9   :  { %v84_v21 = vrot.slane %v73_v17, %v83_v18 }
  0xaa   :  { %v58_v19 = vpop.xlane.xlu1 %57 }
  0xac   :  { %v76_v20 = vpop.xlane.xlu0 %75 }
  0xad   :  { %v88_v22 = vrot.slane %v76_v20, %v83_v18 }
  0xae   :  { %v101_v26 = vpop.permute.xlu1 %100 }
  0xaf   :  { %v90_v23 = vsel %vm89_vm2, %v88_v22, %v84_v21 }
  0xb0   :  { %v92_v25 = vadd.f32 %v90_v23, %v58_v19 }
  0xb2   :  { %v93_v27 = vadd.f32 %v92_v25, %v45_v24 }
  0xb4   :  { %v103_v28 = vadd.f32 %v101_v26, %v93_v27 }
  0xb6   :  { %166 = vtanh.f32 %v103_v28 }
  0xc0   :  { %v167_v29 = vpop.eup %166 }
  0xc1   :  { %v105_v30 = vmul.f32 1.442695, %v167_v29 }
  0xc3   :  { %168 = vpow2.f32 %v105_v30 }
  0xcd   :  { %v169_v31 = vpop.eup %168 }
  0xce   :  { %v108_v32 = vsel %vm107_vm3, %v169_v31, 0.0 }
  0xcf   :  { %109 = vadd.xlane.f32.xlu0 %v108_v32 }
 0x15c   :  { %v110_v33 = vpop.xlane.xlu0 %109 }
 0x15d   :  { %170 = vrcp.f32 %v110_v33 }
 0x167   :  { %v171_v34 = vpop.eup %170 }
 0x168   :  { %v112_v35 = vmul.f32 %v171_v34, %v169_v31 }
 0x16a   :  { %v113_v36 = vadd.f32 %v112_v35, %v45_v24  ;;  %114 = vst.msk [vmem:[#allocation6] sm:$0x3] %vm107_vm3, %v112_v35 }
 0x16c   :  { %v116_v37 = vmin.f32 %v112_v35, %v113_v36  ;;  %115 = vst.msk [vmem:[#allocation7] sm:$0x3] %vm107_vm3, %v113_v36 }
 0x16e   :  { %v117_v38 = vsel %vm107_vm3, %v116_v37, 0.0 }
 0x16f   :  { %118 = vadd.xlane.f32.xlu0 %v117_v38 }
 0x170   :  { %205 = shalt.err (!%p202_p12)
}
 0x171   :  { %s206_s30 = scalar_lea.hbm %s355_s6, 32 }
 0x172   :  { %p207_p13 = scmp.ne.s32.totalorder %s355_s6, %s206_s30  ;;  %p210_p0 = scmp.lt.u32.totalorder %s206_s30, %s355_s6 }
 0x174   :  { %p212_p1 = pnand %p210_p0, %p207_p13 }
 0x176   :  { %215 = shalt.err (!%p212_p1)
}
 0x177   :  { %131 = dma.vmem_to_hbm [thread:$0]  %s129_s4, 32, %s355_s6, [#allocation5]  }
 0x178   :  { %s216_s15 = scalar_lea.vmem %s139_s26, 32  ;;  %p221_p3 = scmp.lt.s32.totalorder %s139_s26, %s139_s26 }
 0x179   :  { %p217_p2 = scmp.ne.s32.totalorder %s139_s26, %s216_s15  ;;  %p222_p4 = scmp.lt.s32.totalorder %s216_s15, %s216_s15 }
 0x17b   :  { %p223_p5 = por %p222_p4, %p221_p3 }
 0x17d   :  { %p224_p6 = pnand %p223_p5, %p217_p2 }
 0x17f   :  { %227 = shalt.err (!%p224_p6)
}
 0x180   :  { %s228_s17 = scalar_lea.hbm %s356_s7, 32 }
 0x181   :  { %p229_p7 = scmp.ne.s32.totalorder %s356_s7, %s228_s17  ;;  %p232_p8 = scmp.lt.u32.totalorder %s228_s17, %s356_s7 }
 0x183   :  { %p234_p9 = pnand %p232_p8, %p229_p7 }
 0x185   :  { %237 = shalt.err (!%p234_p9)
}
 0x186   :  { %141 = dma.vmem_to_hbm [thread:$0]  %s139_s26, 32, %s356_s7, [#allocation8]   ;;  %vm120_vm4 = vcmask 1024  }
 0x1fc   :  { %v119_v39 = vpop.xlane.xlu0 %118 }
 0x1fd   :  { %121 = vst.msk [vmem:[%s357_s8] sm:$0x3] %vm120_vm4, %v119_v39 }
 0x1fe   :  { %240 = dma.done.wait [#allocation5], 32  }
 0x1ff   :  { %241 = vsyncadd [#allocation5], 4294967264 }
 0x200   :  { %242 = dma.done.wait [#allocation8], 32  }
 0x201   :  { %243 = vsyncadd [#allocation8], 4294967264 }
 0x202   :  { %152 = vsyncpa [#allocation4], 1 }
 0x203   :  { %153 = vsyncpa [#allocation5], 1 }
 0x204   :  { %154 = vsyncpa [#allocation8], 1 }

</bundles_post_ra>
